<compile_context>
chip_gen: v7x
topology: tpu7x:2x2x1
jax: 0.10.0
libtpu: 0.0.40
codegen_flags: <defaults>
</compile_context>

<pallas_src>
import functools
import math

import jax
import jax.numpy as jnp
from jax.experimental import pallas as pl
from jax.experimental.pallas import tpu as pltpu


def _rmsnorm_kernel(x_ref, w_ref, o_ref, *, eps: float, inv_dim: float):
    # Hot path, all fp32: square (VPU), row-sum (XLU), rsqrt (EUP), scale (VPU).
    x = x_ref[...].astype(jnp.float32)                    # (tile_rows, dim_p)
    ss = jnp.sum(x * x, axis=-1, keepdims=True)           # (tile_rows, 1)
    # 1/dim folded into the rsqrt argument: one cheap op on the (rows,1) column.
    inv = jax.lax.rsqrt(ss * inv_dim + eps)
    # (1 + weight) computed once per tile here; negligible vs. tile-sized work,
    # and avoids a separate un-hidden XLA op + dim-sized HBM round trip.
    w = 1.0 + w_ref[...].astype(jnp.float32)              # (1, dim_p)
    o_ref[...] = ((x * inv) * w).astype(o_ref.dtype)


def _round_up(a: int, b: int) -> int:
    return ((a + b - 1) // b) * b


def _cdiv(a: int, b: int) -> int:
    return -(-a // b)


def _chip_params():
    """Returns (tile_budget_bytes, vmem_limit_cap_bytes, num_tensorcores)."""
    kind = ""
    try:
        kind = jax.devices()[0].device_kind.lower()
    except Exception:
        pass
    is_v7 = "v7" in kind
    num_cores = 2 if is_v7 else 1

    vmem_cap = None
    try:
        vmem_cap = int(pltpu.get_tpu_info().vmem_capacity_bytes)
    except Exception:
        vmem_cap = None
    if vmem_cap is None or vmem_cap <= 0:
        vmem_cap = (64 << 20) if is_v7 else (128 << 20)

    # Keep total working set comfortably below physical so Mosaic internal
    # scratch and 2-deep pipelining survive: ~48 MiB on v7x, ~64 MiB on v5e/v6e.
    static_cap = (48 << 20) if is_v7 else (64 << 20)
    budget = min(3 * (vmem_cap // 4), static_cap)
    hard_cap = (56 << 20) if is_v7 else (100 << 20)
    return budget, hard_cap, num_cores


def _pick_tile_rows(rows: int, dim_p: int, itemsize: int, sublane: int,
                    budget: int, num_cores: int) -> int:
    slack = 4 << 20
    weight_bytes = 2 * dim_p * 4
    # Honest per-row accounting: 2x(in) + 2x(out) pipeline buffers plus up to
    # two tile-sized fp32 temporaries (x_f32 and x*x) for sub-fp32 inputs.
    per_row = 4 * dim_p * itemsize + 2 * dim_p * 4
    avail = max(budget - slack - weight_bytes, sublane * per_row)
    tile_rows = max(sublane, avail // per_row)

    # Megacore (v7x): keep >= 2 grid steps per TensorCore so no TC sits idle.
    if num_cores > 1:
        per_step = _round_up(max(_cdiv(rows, 2 * num_cores), 1), sublane)
        tile_rows = min(tile_rows, max(per_step, sublane))

    # Never larger than the (sublane-padded) row count; align to packed sublanes.
    tile_rows = _round_up(min(tile_rows, _round_up(rows, sublane)), sublane)
    return int(tile_rows)


def gemma_rmsnorm(x: jax.Array, weight: jax.Array, eps: float = 1e-6,
                  tile_rows: int | None = None) -> jax.Array:
    """x: (..., dim), weight: (dim,). Returns same shape/dtype as x."""
    orig_shape = x.shape
    dim = orig_shape[-1]
    rows = math.prod(orig_shape[:-1]) if len(orig_shape) > 1 else 1

    x2d = x.reshape(rows, dim)
    w2d = weight.reshape(1, dim)

    # Lane guardrail: present a lane-dense (multiple-of-128) last dim to the
    # out_spec so stores are unmasked `vst`.  Production Gemma dims are already
    # multiples of 128, so this pad is a no-op there.
    dim_p = _round_up(dim, 128)
    if dim_p != dim:
        x2d = jnp.pad(x2d, ((0, 0), (0, dim_p - dim)))
        w2d = jnp.pad(w2d, ((0, 0), (0, dim_p - dim)))

    itemsize = jnp.dtype(x.dtype).itemsize
    # Sublane packing: one 32-bit sublane group holds 8 fp32 rows / 16 bf16 rows.
    sublane = max(8, 32 // max(itemsize, 1))

    budget, hard_cap, num_cores = _chip_params()
    if tile_rows is None:
        tile_rows = _pick_tile_rows(rows, dim_p, itemsize, sublane, budget, num_cores)
    else:
        tile_rows = _round_up(min(tile_rows, _round_up(rows, sublane)), sublane)

    grid = _cdiv(rows, tile_rows)

    # Explicit VMEM budget, honestly accounting for the fp32 intermediates and
    # capped below physical so 2-deep pipelining is preserved on v7x.
    w_itemsize = jnp.dtype(weight.dtype).itemsize
    vmem_limit = (4 * tile_rows * dim_p * itemsize     # in + out, 2 buffers each
                  + 2 * tile_rows * dim_p * 4          # fp32 temps (x_f32, x*x)
                  + 2 * dim_p * max(w_itemsize, 4)     # weight block (+ f32 copy)
                  + (4 << 20))                         # Mosaic internal scratch slack
    vmem_limit = int(min(max(vmem_limit, 16 << 20), hard_cap))

    kernel = functools.partial(_rmsnorm_kernel, eps=eps, inv_dim=1.0 / dim)

    out2d = pl.pallas_call(
        kernel,
        out_shape=jax.ShapeDtypeStruct((rows, dim_p), x.dtype),
        grid_spec=pltpu.PrefetchScalarGridSpec(
            num_scalar_prefetch=0,
            grid=(grid,),
            in_specs=[
                pl.BlockSpec((tile_rows, dim_p), lambda i: (i, 0)),
                pl.BlockSpec((1, dim_p), lambda i: (0, 0)),
            ],
            out_specs=pl.BlockSpec((tile_rows, dim_p), lambda i: (i, 0)),
        ),
        compiler_params=pltpu.CompilerParams(
            dimension_semantics=("parallel",),
            vmem_limit_bytes=vmem_limit),
    )(x2d, w2d)

    if dim_p != dim:
        out2d = out2d[:, :dim]
    return out2d.reshape(orig_shape)


def _reference(x, weight, eps=1e-6):
    xf = x.astype(jnp.float32)
    ms = jnp.mean(xf * xf, axis=-1, keepdims=True)
    out = xf * jax.lax.rsqrt(ms + eps)
    out = out * (1.0 + weight.astype(jnp.float32))
    return out.astype(x.dtype)


if __name__ == "__main__":
    key = jax.random.PRNGKey(0)
    kx, kw, kx2, kw2 = jax.random.split(key, 4)

    # Case 1: bf16 input (fp32-compute / cast-back path), dim=32 exercises the
    # lane-padding guardrail (32 -> 128).
    batch, seq, dim = 2, 8, 32
    x = jax.random.normal(kx, (batch, seq, dim), dtype=jnp.float32).astype(jnp.bfloat16)
    # GemmaRMSNorm initializes weight to zeros(dim); add small values so the
    # (1 + weight) scale is exercised.
    weight = 0.01 * jax.random.normal(kw, (dim,), dtype=jnp.float32)

    out = jax.block_until_ready(gemma_rmsnorm(x, weight, eps=1e-6))
    ref = _reference(x, weight, eps=1e-6)
    assert out.shape == x.shape and out.dtype == x.dtype
    assert jnp.allclose(out.astype(jnp.float32), ref.astype(jnp.float32),
                        atol=1e-2, rtol=1e-2)

    # Case 2: fp32 input, ragged row count (rows=15) and lane-dense dim=128 —
    # exercises the cdiv / padded-tail path with no dim padding.
    b2, s2, d2 = 3, 5, 128
    x2 = jax.random.normal(kx2, (b2, s2, d2), dtype=jnp.float32)
    w2 = 0.01 * jax.random.normal(kw2, (d2,), dtype=jnp.float32)

    out2 = jax.block_until_ready(gemma_rmsnorm(x2, w2, eps=1e-6))
    ref2 = _reference(x2, w2, eps=1e-6)
    assert out2.shape == x2.shape and out2.dtype == x2.dtype
    assert jnp.allclose(out2, ref2, atol=1e-5, rtol=1e-5)

    print("KERNEL_OK")
</pallas_src>

<mosaic_0001>
module attributes {stable_mosaic.version = 11 : i64} {
  func.func @_rmsnorm_kernel(%arg0: i32, %arg1: memref<16x128xbf16, #tpu.memory_space<vmem>>, %arg2: memref<1x128xf32, #tpu.memory_space<vmem>>, %arg3: memref<16x128xbf16, #tpu.memory_space<vmem>>) attributes {dimension_semantics = [#tpu.dimension_semantics<parallel>], iteration_bounds = array<i64: 1>, scalar_prefetch = 0 : i64, scratch_operands = 0 : i64, tpu.core_type = #tpu.core_type<tc>, window_params = [{transform_indices = @transform_0, window_bounds = array<i64: 16, 128>}, {pipeline_mode = #tpu.pipeline_mode<synchronous>, transform_indices = @transform_1, window_bounds = array<i64: 1, 128>}, {transform_indices = @transform_2, window_bounds = array<i64: 16, 128>}]} {
    %c0 = arith.constant 0 : index
    %c0_0 = arith.constant 0 : index
    %0 = vector.load %arg1[%c0, %c0_0] : memref<16x128xbf16, #tpu.memory_space<vmem>>, vector<16x128xbf16>
    %1 = arith.extf %0 : vector<16x128xbf16> to vector<16x128xf32>
    %2 = arith.mulf %1, %1 : vector<16x128xf32>
    %cst = arith.constant dense<0.000000e+00> : vector<16xf32>
    %3 = vector.multi_reduction <add>, %2, %cst [1] : vector<16x128xf32> to vector<16xf32>
    %4 = vector.shape_cast %3 : vector<16xf32> to vector<16x1xf32>
    %cst_1 = arith.constant 3.125000e-02 : f32
    %5 = vector.broadcast %cst_1 : f32 to vector<16x1xf32>
    %6 = arith.mulf %4, %5 : vector<16x1xf32>
    %cst_2 = arith.constant 9.99999997E-7 : f32
    %7 = vector.broadcast %cst_2 : f32 to vector<16x1xf32>
    %8 = arith.addf %6, %7 : vector<16x1xf32>
    %9 = math.rsqrt %8 : vector<16x1xf32>
    %c0_3 = arith.constant 0 : index
    %c0_4 = arith.constant 0 : index
    %10 = vector.load %arg2[%c0_3, %c0_4] : memref<1x128xf32, #tpu.memory_space<vmem>>, vector<1x128xf32>
    %cst_5 = arith.constant 1.000000e+00 : f32
    %11 = vector.broadcast %cst_5 : f32 to vector<1x128xf32>
    %12 = arith.addf %11, %10 : vector<1x128xf32>
    %13 = vector.broadcast %9 : vector<16x1xf32> to vector<16x128xf32>
    %14 = arith.mulf %1, %13 : vector<16x128xf32>
    %15 = vector.broadcast %12 : vector<1x128xf32> to vector<16x128xf32>
    %16 = arith.mulf %14, %15 : vector<16x128xf32>
    %17 = arith.truncf %16 : vector<16x128xf32> to vector<16x128xbf16>
    %c0_6 = arith.constant 0 : index
    %c0_7 = arith.constant 0 : index
    %18 = vector.load %arg3[%c0_6, %c0_7] : memref<16x128xbf16, #tpu.memory_space<vmem>>, vector<16x128xbf16>
    tpu.vector_store %arg3[%c0_6, %c0_7], %17 {strides = array<i32>} : memref<16x128xbf16, #tpu.memory_space<vmem>>, vector<16x128xbf16>,
    return
  }
  func.func @transform_0(%arg0: i32) -> (i32, i32) {
    %c0_i32 = arith.constant 0 : i32
    %c0_i32_0 = arith.constant 0 : i32
    return %arg0, %c0_i32 : i32, i32
  }
  func.func @transform_1(%arg0: i32) -> (i32, i32) {
    %c0_i32 = arith.constant 0 : i32
    %c0_i32_0 = arith.constant 0 : i32
    %c0_i32_1 = arith.constant 0 : i32
    return %c0_i32, %c0_i32_0 : i32, i32
  }
  func.func @transform_2(%arg0: i32) -> (i32, i32) {
    %c0_i32 = arith.constant 0 : i32
    %c0_i32_0 = arith.constant 0 : i32
    return %arg0, %c0_i32 : i32, i32
  }
}

</mosaic_0001>

<bundles_post_ra>
// kernel: tpu_custom_call.1
= control target key start
LH: loop header
LB: loop body
LE: loop exit
PB: predicated region body
PF: predicated region fallthrough
CT: control target
= control target key end

     0   :  { %7 = vsyncpa [#allocation3], 0  ;;  %s202_s0 = inlined_call_operand.hbm [shape: bf16[16,128], index: 0, kind: input, shape index: {}]   ;;  %s203_s1 = inlined_call_operand.vmem [shape: f32[1,128], index: 1, kind: input, shape index: {}]   ;;  %s204_s2 = inlined_call_operand.hbm [shape: bf16[16,128], index: 2, kind: output, shape index: {}]  }
   0x1   :  { %8 = vsyncpa [#allocation4], 0  ;;  %s150_s9 = smov [#allocation2]   ;;  %s102_s13 = scalar_lea.hbm %s202_s0, 128 }
   0x2   :  { %s14_s10 = sshll.u32 %s150_s9, 4  ;;  %p103_p0 = scmp.ne.s32.totalorder %s202_s0, %s102_s13  ;;  %s15_s10 = int_to_ptr.vmem [resolvable:$true] %s14_s10 }
   0x3   :  { %p106_p1 = scmp.lt.u32.totalorder %s102_s13, %s202_s0 }
   0x5   :  { %p108_p2 = pnand %p106_p1, %p103_p0 }
   0x7   :  { %111 = shalt.err (!%p108_p2)
}
   0x8   :  { %s112_s18 = scalar_lea.vmem %s15_s10, 128  ;;  %p117_p4 = scmp.lt.s32.totalorder %s15_s10, %s15_s10 }
   0x9   :  { %p113_p3 = scmp.ne.s32.totalorder %s15_s10, %s112_s18  ;;  %p118_p5 = scmp.lt.s32.totalorder %s112_s18, %s112_s18 }
   0xb   :  { %p119_p6 = por %p118_p5, %p117_p4 }
   0xd   :  { %p120_p7 = pnand %p119_p6, %p113_p3 }
   0xf   :  { %123 = shalt.err (!%p120_p7)
}
  0x10   :  { %s151_s19 = smov 64   ;;  %s152_s20 = smov 4  }
  0x11   :  { %20 = dma.hbm_to_vmem [thread:$0]  %s202_s0, 128, %s15_s10, [#allocation3], %s151_s19, %s151_s19, %s152_s20  }
  0x12   :  { %146 = dma.done.wait [#allocation3], 128  }
  0x13   :  { %147 = vsyncadd [#allocation3], 4294967168  ;;  %v86_v0 = vld [vmem:[#allocation2] sm:$0xff]   ;;  %v47_v10 = vlaneseq  ;;  %s153_s24 = smov [#allocation5]  }
  0x14   :  { %v87_v1 = vunpack.c.l.bf16 %v86_v0  ;;  %v88_v2 = vunpack.c.h.bf16 %v86_v0  ;;  %v42_v13 = vld [vmem:[%s203_s1] sm:$0x1]  ;;  %s69_s25 = sshll.u32 %s153_s24, 4  ;;  %s70_s25 = int_to_ptr.vmem [resolvable:$true] %s69_s25 }
  0x15   :  { %v48_v12 = vshrl.u32 %v47_v10, 7  ;;  %v43_v14 = vadd.f32 1.0, %v42_v13  ;;  %s124_s26 = scalar_lea.vmem %s70_s25, 128  ;;  %p129_p9 = scmp.lt.s32.totalorder %s70_s25, %s70_s25 }
  0x16   :  { %v30_v3 = vmul.f32 %v87_v1, %v87_v1  ;;  %v31_v4 = vmul.f32 %v88_v2, %v88_v2  ;;  %p125_p8 = scmp.ne.s32.totalorder %s70_s25, %s124_s26  ;;  %p130_p10 = scmp.lt.s32.totalorder %s124_s26, %s124_s26 }
  0x17   :  { %v49_v15 = vsub.s32 0, %v48_v12 }
  0x18   :  { %32 = vadd.xlane.f32.xlu0 %v30_v3  ;;  %p131_p11 = por %p130_p10, %p129_p9 }
  0x19   :  { %v50_v18 = vrot.slane %v43_v14, %v49_v15 }
  0x1a   :  { %p132_p12 = pnand %p131_p11, %p125_p8 }
  0x1c   :  { %34 = vadd.xlane.f32.xlu0 %v31_v4 }
  0xa5   :  { %v33_v5 = vpop.xlane.xlu0 %32 }
  0xa6   :  { %v36_v6 = vmul.f32 0.03125, %v33_v5 }
  0xa8   :  { %v38_v7 = vadd.f32 1e-06, %v36_v6 }
  0xa9   :  { %v35_v8 = vpop.xlane.xlu0 %34 }
  0xaa   :  { %98 = vrsqrt.f32 %v38_v7  ;;  %v37_v9 = vmul.f32 0.03125, %v35_v8 }
  0xac   :  { %v39_v11 = vadd.f32 1e-06, %v37_v9 }
  0xae   :  { %100 = vrsqrt.f32 %v39_v11 }
  0xb4   :  { %v99_v16 = vpop.eup %98 }
  0xb5   :  { %v44_v17 = vmul.f32 %v99_v16, %v87_v1 }
  0xb7   :  { %v52_v21 = vmul.f32 %v50_v18, %v44_v17 }
  0xb8   :  { %v101_v19 = vpop.eup %100 }
  0xb9   :  { %v45_v20 = vmul.f32 %v101_v19, %v88_v2 }
  0xbb   :  { %v53_v22 = vmul.f32 %v50_v18, %v45_v20 }
  0xbd   :  { %v92_v23 = vpack.c.bf16 %v53_v22, %v52_v21 }
  0xbf   :  { %93 = vst [vmem:[#allocation5] sm:$0xff] %v92_v23  }
  0xc0   :  { %135 = shalt.err (!%p132_p12)
}
  0xc1   :  { %s136_s28 = scalar_lea.hbm %s204_s2, 128 }
  0xc2   :  { %p137_p13 = scmp.ne.s32.totalorder %s204_s2, %s136_s28  ;;  %p140_p0 = scmp.lt.u32.totalorder %s136_s28, %s204_s2 }
  0xc4   :  { %p142_p1 = pnand %p140_p0, %p137_p13 }
  0xc6   :  { %145 = shalt.err (!%p142_p1)
}
  0xc7   :  { %75 = dma.vmem_to_hbm [thread:$0]  %s70_s25, 128, %s204_s2, [#allocation4], %s151_s19, %s151_s19, %s152_s20  }
  0xc8   :  { %148 = dma.done.wait [#allocation4], 128  }
  0xc9   :  { %149 = vsyncadd [#allocation4], 4294967168 }
  0xca   :  { %79 = vsyncpa [#allocation3], 1 }
  0xcb   :  { %80 = vsyncpa [#allocation4], 1 }

</bundles_post_ra>
